<compile_context>
chip_gen: v7x
topology: tpu7x:2x2x1
jax: 0.10.0
libtpu: 0.0.40
codegen_flags: <defaults>
</compile_context>

<pallas_src>
import functools

import jax
import jax.numpy as jnp
from jax.experimental import pallas as pl
from jax.experimental.pallas import tpu as pltpu


def _matmul_kernel(a_ref, b_ref, o_ref, acc_ref):
    """One (tm, tn) output tile; K (grid axis 2) is the innermost reduction.

    The output/accumulator block index is constant across the K axis and K is
    the last ("arbitrary") grid dimension, so acc_ref stays VMEM-resident for
    the whole reduction; o_ref is written exactly once, on the last K step,
    already cast to the result dtype.
    """
    @pl.when(pl.program_id(2) == 0)
    def _():
        acc_ref[...] = jnp.zeros_like(acc_ref)

    acc_ref[...] += jnp.dot(
        a_ref[...], b_ref[...], preferred_element_type=jnp.float32
    )

    @pl.when(pl.program_id(2) == pl.num_programs(2) - 1)
    def _():
        o_ref[...] = acc_ref[...].astype(o_ref.dtype)


def _round_up(x: int, m: int) -> int:
    return ((x + m - 1) // m) * m


def _fit_tiles(dim: int, max_tile: int, granule: int, n_blocks: int | None = None):
    """Uniform tile (multiple of `granule`, <= max_tile) + padded dim + #blocks.

    Pads only to the hardware granule per block (balanced tiling) instead of
    rounding the whole dim up to a full `max_tile`.
    """
    dim_g = _round_up(dim, granule)
    if n_blocks is None:
        n_blocks = -(-dim_g // max_tile)  # cdiv
    tile = _round_up(-(-dim // n_blocks), granule)
    # Drop fully-empty trailing blocks (can happen when a split was forced).
    while n_blocks > 1 and tile * (n_blocks - 1) >= dim_g:
        n_blocks -= 1
        tile = _round_up(-(-dim // n_blocks), granule)
    return tile, tile * n_blocks, n_blocks


@functools.partial(jax.jit, static_argnames=("tm", "tn", "tk"))
def custom_op_matmul(
    a: jax.Array, b: jax.Array, *, tm: int = 512, tn: int = 512, tk: int = 1024
) -> jax.Array:
    """Pallas equivalent of CustomPytorchCPPModule(mmul_op).forward(a, b)."""
    M, K = a.shape
    K2, N = b.shape
    assert K == K2, "inner dimensions must match"
    if not (jnp.issubdtype(a.dtype, jnp.floating)
            and jnp.issubdtype(b.dtype, jnp.floating)):
        raise TypeError("custom_op_matmul supports floating-point inputs only "
                        "(no integer MXU path on v7x).")

    out_dtype = jnp.result_type(a.dtype, b.dtype)

    # Balanced tiling: tiles satisfy the (8, 128) constraint and dims are padded
    # only to the granule times the block count (not to a full max tile).
    tm_e, Mp, gm = _fit_tiles(M, tm, 8)
    tn_e, Np, gn = _fit_tiles(N, tn, 128)
    tk_e, Kp, gk = _fit_tiles(K, tk, 128)

    # v7x megacore: keep at least 2 blocks on a "parallel" axis when possible so
    # both TensorCores get work (cheap no-op on single-TC v5e/v6e).
    if gm == 1 and gn == 1:
        if _round_up(N, 128) >= 256:
            tn_e, Np, gn = _fit_tiles(N, tn, 128, n_blocks=2)
        elif _round_up(M, 8) >= 16:
            tm_e, Mp, gm = _fit_tiles(M, tm, 8, n_blocks=2)

    a_p = a if (Mp == M and Kp == K) else jnp.pad(a, ((0, Mp - M), (0, Kp - K)))
    b_p = b if (Kp == K and Np == N) else jnp.pad(b, ((0, Kp - K), (0, Np - N)))

    itemsize_a = jnp.dtype(a.dtype).itemsize
    itemsize_b = jnp.dtype(b.dtype).itemsize
    itemsize_o = jnp.dtype(out_dtype).itemsize

    # VMEM budget: double-buffered A/B/out blocks + f32 scratch accumulator.
    vmem_need = (2 * (tm_e * tk_e * itemsize_a + tk_e * tn_e * itemsize_b)
                 + 2 * tm_e * tn_e * itemsize_o
                 + tm_e * tn_e * 4)
    vmem_limit = min(48 << 20, max(2 * vmem_need, 16 << 20))

    cost = pl.CostEstimate(
        flops=2 * M * N * K,
        transcendentals=0,
        bytes_accessed=(Mp * Kp * itemsize_a * gn
                        + Kp * Np * itemsize_b * gm
                        + Mp * Np * itemsize_o),
    )

    out_p = pl.pallas_call(
        _matmul_kernel,
        out_shape=jax.ShapeDtypeStruct((Mp, Np), out_dtype),
        grid_spec=pltpu.PrefetchScalarGridSpec(
            num_scalar_prefetch=0,
            grid=(gm, gn, gk),
            in_specs=[
                pl.BlockSpec((tm_e, tk_e), lambda i, j, k: (i, k)),  # A tile
                pl.BlockSpec((tk_e, tn_e), lambda i, j, k: (k, j)),  # B tile
            ],
            out_specs=pl.BlockSpec((tm_e, tn_e), lambda i, j, k: (i, j)),
            scratch_shapes=[pltpu.VMEM((tm_e, tn_e), jnp.float32)],
        ),
        compiler_params=pltpu.CompilerParams(
            dimension_semantics=("parallel", "parallel", "arbitrary"),
            vmem_limit_bytes=vmem_limit,
        ),
        cost_estimate=cost,
    )(a_p, b_p)

    return out_p[:M, :N] if (Mp != M or Np != N) else out_p


class CustomPallasModule:
    """Mirror of CustomPytorchCPPModule: wraps a callable 'op'."""

    def __init__(self, func):
        self.op = func

    def is_cuda_supported(self):
        return False  # TPU backend

    def forward(self, *args):
        return self.op(*args)

    __call__ = forward


if __name__ == "__main__":
    key = jax.random.PRNGKey(0)
    k1, k2, k3, k4, k5, k6, k7, k8 = jax.random.split(key, 8)

    module = CustomPallasModule(custom_op_matmul)

    # Case 1: small aligned shapes — single-tile M/K, forced 2-way N split
    # (megacore heuristic), grid (1, 2, 1).
    M, K, N = 256, 384, 512
    a = jax.random.normal(k1, (M, K), dtype=jnp.float32)
    b = jax.random.normal(k2, (K, N), dtype=jnp.float32)
    out = jax.block_until_ready(module(a, b))
    ref = a @ b
    assert out.shape == ref.shape and out.dtype == ref.dtype
    assert jnp.allclose(out, ref, atol=1e-2, rtol=1e-3), "mismatch vs reference"

    # Case 2: ragged shapes — exercises granule-only padding + output slice.
    M2, K2, N2 = 200, 300, 136
    a2 = jax.random.normal(k3, (M2, K2), dtype=jnp.float32)
    b2 = jax.random.normal(k4, (K2, N2), dtype=jnp.float32)
    out2 = jax.block_until_ready(module(a2, b2))
    ref2 = a2 @ b2
    assert out2.shape == (M2, N2)
    assert jnp.allclose(out2, ref2, atol=1e-2, rtol=1e-3), "mismatch (padded path)"

    # Case 3: explicit small tiles — exercises the multi-step K reduction with
    # accumulator init (k == 0) and finalize/writeback (k == last), grid (2, 2, 3).
    M3, K3, N3 = 256, 384, 256
    a3 = jax.random.normal(k5, (M3, K3), dtype=jnp.float32)
    b3 = jax.random.normal(k6, (K3, N3), dtype=jnp.float32)
    out3 = jax.block_until_ready(custom_op_matmul(a3, b3, tm=128, tn=128, tk=128))
    ref3 = a3 @ b3
    assert jnp.allclose(out3, ref3, atol=1e-2, rtol=1e-3), "mismatch (multi-K path)"

    # Case 4: bf16 inputs — native MXU path, f32 accumulate, in-kernel bf16 finalize.
    M4, K4, N4 = 128, 256, 256
    a4 = jax.random.normal(k7, (M4, K4), dtype=jnp.bfloat16)
    b4 = jax.random.normal(k8, (K4, N4), dtype=jnp.bfloat16)
    out4 = jax.block_until_ready(module(a4, b4))
    assert out4.dtype == jnp.bfloat16
    ref4 = (a4.astype(jnp.float32) @ b4.astype(jnp.float32)).astype(jnp.bfloat16)
    assert jnp.allclose(out4.astype(jnp.float32), ref4.astype(jnp.float32),
                        atol=1e-1, rtol=2e-2), "mismatch (bf16 path)"

    print("KERNEL_OK")
</pallas_src>

<mosaic_0001>
module attributes {stable_mosaic.version = 11 : i64} {
  func.func @_matmul_kernel(%arg0: i32, %arg1: i32, %arg2: i32, %arg3: memref<256x384xf32, #tpu.memory_space<vmem>>, %arg4: memref<384x256xf32, #tpu.memory_space<vmem>>, %arg5: memref<256x256xf32, #tpu.memory_space<vmem>>, %arg6: memref<256x256xf32, #tpu.memory_space<vmem>>) attributes {dimension_semantics = [#tpu.dimension_semantics<parallel>, #tpu.dimension_semantics<parallel>, #tpu.dimension_semantics<arbitrary>], iteration_bounds = array<i64: 1, 2, 1>, scalar_prefetch = 0 : i64, scratch_operands = 1 : i64, tpu.core_type = #tpu.core_type<tc>, window_params = [{transform_indices = @transform_0, window_bounds = array<i64: 256, 384>}, {transform_indices = @transform_1, window_bounds = array<i64: 384, 256>}, {transform_indices = @transform_2, window_bounds = array<i64: 256, 256>}]} {
    %c0_i32 = arith.constant 0 : i32
    %0 = arith.cmpi eq, %arg2, %c0_i32 : i32
    %1 = arith.extui %0 : i1 to i32
    %c0_i32_0 = arith.constant 0 : i32
    %2 = arith.cmpi ne, %1, %c0_i32_0 : i32
    scf.if %2 {
      %cst_10 = arith.constant 0.000000e+00 : f32
      %12 = vector.broadcast %cst_10 : f32 to vector<256x256xf32>
      %c0_11 = arith.constant 0 : index
      %c0_12 = arith.constant 0 : index
      %13 = vector.load %arg6[%c0_11, %c0_12] : memref<256x256xf32, #tpu.memory_space<vmem>>, vector<256x256xf32>
      tpu.vector_store %arg6[%c0_11, %c0_12], %12 {strides = array<i32>} : memref<256x256xf32, #tpu.memory_space<vmem>>, vector<256x256xf32>,
    } else {
    }
    %c0 = arith.constant 0 : index
    %c0_1 = arith.constant 0 : index
    %3 = vector.load %arg6[%c0, %c0_1] : memref<256x256xf32, #tpu.memory_space<vmem>>, vector<256x256xf32>
    %c0_2 = arith.constant 0 : index
    %c0_3 = arith.constant 0 : index
    %4 = vector.load %arg3[%c0_2, %c0_3] : memref<256x384xf32, #tpu.memory_space<vmem>>, vector<256x384xf32>
    %c0_4 = arith.constant 0 : index
    %c0_5 = arith.constant 0 : index
    %5 = vector.load %arg4[%c0_4, %c0_5] : memref<384x256xf32, #tpu.memory_space<vmem>>, vector<384x256xf32>
    %cst = arith.constant dense<0.000000e+00> : vector<256x256xf32>
    %6 = tpu.matmul %4, %5, %cst {dimension_numbers = #tpu.dot_dimension_numbers<[1], [0], [0], [1], [0, 0, 1, 1], [], []>} : vector<256x384xf32>, vector<384x256xf32>, vector<256x256xf32> -> vector<256x256xf32>
    %7 = arith.addf %3, %6 : vector<256x256xf32>
    %c0_6 = arith.constant 0 : index
    %c0_7 = arith.constant 0 : index
    %8 = vector.load %arg6[%c0_6, %c0_7] : memref<256x256xf32, #tpu.memory_space<vmem>>, vector<256x256xf32>
    tpu.vector_store %arg6[%c0_6, %c0_7], %7 {strides = array<i32>} : memref<256x256xf32, #tpu.memory_space<vmem>>, vector<256x256xf32>,
    %c0_i32_8 = arith.constant 0 : i32
    %9 = arith.cmpi eq, %arg2, %c0_i32_8 : i32
    %10 = arith.extui %9 : i1 to i32
    %c0_i32_9 = arith.constant 0 : i32
    %11 = arith.cmpi ne, %10, %c0_i32_9 : i32
    scf.if %11 {
      %c0_10 = arith.constant 0 : index
      %c0_11 = arith.constant 0 : index
      %12 = vector.load %arg6[%c0_10, %c0_11] : memref<256x256xf32, #tpu.memory_space<vmem>>, vector<256x256xf32>
      %c0_12 = arith.constant 0 : index
      %c0_13 = arith.constant 0 : index
      %13 = vector.load %arg5[%c0_12, %c0_13] : memref<256x256xf32, #tpu.memory_space<vmem>>, vector<256x256xf32>
      tpu.vector_store %arg5[%c0_12, %c0_13], %12 {strides = array<i32>} : memref<256x256xf32, #tpu.memory_space<vmem>>, vector<256x256xf32>,
    } else {
    }
    return
  }
  func.func @transform_0(%arg0: i32, %arg1: i32, %arg2: i32) -> (i32, i32) {
    %c0_i32 = arith.constant 0 : i32
    return %arg0, %arg2 : i32, i32
  }
  func.func @transform_1(%arg0: i32, %arg1: i32, %arg2: i32) -> (i32, i32) {
    %c0_i32 = arith.constant 0 : i32
    return %arg2, %arg1 : i32, i32
  }
  func.func @transform_2(%arg0: i32, %arg1: i32, %arg2: i32) -> (i32, i32) {
    %c0_i32 = arith.constant 0 : i32
    return %arg0, %arg1 : i32, i32
  }
}

</mosaic_0001>

<bundles_post_ra>
// kernel: custom_op_matmul.1
= control target key start
LH: loop header
LB: loop body
LE: loop exit
PB: predicated region body
PF: predicated region fallthrough
CT: control target
= control target key end

     0   :  { %7 = vsyncpa [#allocation4], 0  ;;  %s2295_s0 = inlined_call_operand.hbm [shape: f32[256,384], index: 0, kind: input, shape index: {}]   ;;  %s2296_s1 = inlined_call_operand.hbm [shape: f32[384,512], index: 1, kind: input, shape index: {}]   ;;  %s2297_s2 = inlined_call_operand.hbm [shape: f32[256,512], index: 2, kind: output, shape index: {}]  }
   0x1   :  { %8 = vsyncpa [#allocation7], 0 }
   0x2   :  { %10 = vsyncpa [#allocation7 + $0x1], 0 }
   0x3   :  { %11 = vsyncpa [#allocation5], 0 }
   0x4   :  { %13 = vsyncpa [#allocation5 + $0x1], 0  ;;  %s1877_s9 = smov 0   ;;  %s1879_s10 = smov 0  }
   0x5   :  { %s1881_s11 = smov 0   ;;  %s1883_s12 = smov 0  }
   0x6   :  { %s1885_s13 = smov 0   ;;  %s1887_s14 = smov 0  }
   0x7 LB: > { %s1443_s15 = sadd.s32 4294967295, %s1848_s14   ;;  %s1444_s16 = sadd.s32 4294967294, %s1848_s14   ;;  %s1848_s14 = sphi %s1887_s14, %s19_s14   ;;  %s1844_s13 = sphi %s1885_s13, %s2323_s13   ;;  %s1840_s12 = sphi %s1883_s12, %s2322_s12   ;;  %s1836_s11 = sphi %s1881_s11, %s2321_s11   ;;  %s1832_s10 = sphi %s1879_s10, %s2320_s10   ;;  %s1828_s9 = sphi %s1877_s9, %s2319_s9  }
   0x8   : > { %p82_p0 = scmp.ne.s32.totalorder %s1836_s11, %s1832_s10  ;;  %p83_p1 = scmp.eq.s32.totalorder %s1848_s14, 0 }
   0x9   : > { %p88_p2 = scmp.ne.s32.totalorder %s1832_s10, %s1828_s9  ;;  %p1914_p3 = scmp.eq.s32.totalorder %s1443_s15, 0 }
   0xa   : > { %p1918_p4 = por %p83_p1, %p82_p0  ;;  %p114_p5 = scmp.eq.s32.totalorder %s1443_s15, 1 }
   0xb   : > { %s2304_s17 = scalar_select %p1914_p3, 1, 0 }
   0xc   : > { %p1924_p6 = por %p1914_p3, %p88_p2  ;;  %p120_p7 = scmp.eq.s32.totalorder %s1444_s16, 1 }
   0xd   : > { %p1928_p8 = por %p114_p5, %p82_p0  ;;  %p1445_p9 = scmp.ge.s32.totalorder %s1848_s14, 1 }
   0xe   : > { %s2306_s19 = scalar_select %p1924_p6, 1, 0 }
   0xf   : > { %s2307_s20 = scalar_select %p1928_p8, 1, 0 }
  0x10   : > { %p1933_p10 = por %p120_p7, %p88_p2  ;;  %p127_p11 = scmp.lt.s32.totalorder %s1848_s14, 3 }
  0x11   : > { %s1850_s23 = smov [#allocation3]   ;;  %p1643_p1 = scmp.lt.s32.totalorder %s1848_s14, 2 }
  0x12   : > { %s2308_s21 = scalar_select %p1933_p10, 1, 0 }
  0x13   : > { %p1938_p12 = pnand %p1445_p9, %p127_p11  ;;  %s145_s24 = sshll.u32 %s1850_s23, 4  ;;  %s1942_s24 = int_to_ptr.vmem [resolvable:$true] %s145_s24 }
  0x14   : > { %p1956_p2 = pnand %p1643_p1, %p1918_p4  ;;  %s34_s27 = sadd.s32 1, %s1844_s13 }
  0x15   : > { %s2309_s22 = scalar_select %p1938_p12, 1, 0 }
  0x16   : > { %p1630_p13 = pneg %p1938_p12  ;;  %s1704_s30 = scalar_lea.hbm %s2295_s0, 12288 }
  0x17   : > { %s2311_s26 = scalar_select %p1956_p2, 1, 0 }
  0x18   : > { %p1950_p5 = pnand %p1630_p13, %p1914_p3  ;;  %p1705_p7 = scmp.ne.s32.totalorder %s2295_s0, %s1704_s30 }
  0x19   : > { %p1711_p4 = scmp.lt.u32.totalorder %s1704_s30, %s2295_s0 }
  0x1a   : > { %p1706_p9 = pneg %p1950_p5 }
  0x1c   : > { %p1707_p11 = pnand %p1706_p9, %p1705_p7 }
  0x1e   : > { %p1708_p13 = pneg %p1707_p11 }
  0x20   : > { %p1713_p1 = pnand %p1711_p4, %p1708_p13 }
  0x22   : > { %1716 = shalt.err (!%p1713_p1)
}
  0x23   : > { %s1717_s7 = scalar_lea.vmem %s1942_s24, 12288  ;;  %p1725_p6 = scmp.lt.s32.totalorder %s1942_s24, %s1942_s24 }
  0x24   : > { %p1718_p0 = scmp.ne.s32.totalorder %s1942_s24, %s1717_s7  ;;  %p1726_p3 = scmp.lt.s32.totalorder %s1717_s7, %s1717_s7 }
  0x26   : > { %p1720_p10 = pnand %p1718_p0, %p1706_p9  ;;  %p1727_p12 = por %p1726_p3, %p1725_p6 }
  0x28   : > { %p1721_p8 = pneg %p1720_p10 }
  0x2a   : > { %p1728_p2 = pnand %p1727_p12, %p1721_p8 }
  0x2c   : > { %1731 = shalt.err (!%p1728_p2)
}
  0x2d   : > { %s1851_s8 = smov 384   ;;  %s1852_s15 = smov 24  }
  0x2e   : > { %1633 = dma.hbm_to_vmem [thread:$0]  (!%p1950_p5), %s2295_s0, 12288, %s1942_s24, [#allocation4], %s1851_s8, %s1851_s8, %s1852_s15  }
  0x2f   : > { %p36_p10 = scmp.ge.s32.totalorder %s34_s27, 2  ;;  %s75_s23 = sadd.s32 1, %s1836_s11 }
  0x30   : > { %s159_s28 = sand.u32 1, %s1836_s11   ;;  %s1458_s3 = sshll.u32 %s1844_s13, 8 }
  0x31   : > { %s2325_s27 = smov (%p36_p10, %s34_s27), 0  ;;  %s1620_s29 = smul.u32 768, %s159_s28 }
  0x32   : > { %s71_s30 = ssub.s32 %s1844_s13, %s2325_s27  ;;  %s1992_s25 = scalar_lea.hbm %s2296_s1, %s1458_s3 }
  0x33   : > { %p73_p3 = scmp.eq.s32.totalorder %s71_s30, 0  ;;  %s163_s24 = scalar_lea.vmem [#allocation6], %s1620_s29 }
  0x34   : > { %s173_s6 = sshll.u32 %s163_s24, 4  ;;  %s1999_s8 = scalar_lea.sflag [#allocation7], %s159_s28  ;;  %s1997_s6 = int_to_ptr.vmem [resolvable:$true] %s173_s6 }
  0x35   : > { %s1995_s7 = scalar_select %p73_p3, %s1836_s11, %s75_s23  }
  0x36   : > { %s1732_s15 = scalar_lea.hbm %s1992_s25, 12288  ;;  %p2312_p8 = scmp.ne.s32.totalorder %s2311_s26, 0 }
  0x37   : > { %p1733_p6 = scmp.ne.s32.totalorder %s1992_s25, %s1732_s15  ;;  %s1737_s30 = scalar_lea.hbm %s2296_s1, 24576 }
  0x38   : > { %p1734_p12 = pneg %p2312_p8  ;;  %p1738_p2 = scmp.lt.u32.totalorder %s1992_s25, %s2296_s1 }
  0x39   : > { %p1739_p7 = scmp.lt.u32.totalorder %s1737_s30, %s1732_s15  ;;  %p1741_p11 = scmp.lt.u32.totalorder %s1732_s15, %s1992_s25 }
  0x3a   : > { %p1735_p0 = pnand %p1734_p12, %p1733_p6 }
  0x3b   : > { %p1740_p9 = por %p1739_p7, %p1738_p2 }
  0x3c   : > { %p1736_p5 = pneg %p1735_p0 }
  0x3d   : > { %p1742_p13 = por %p1741_p11, %p1740_p9 }
  0x3f   : > { %p1743_p4 = pnand %p1742_p13, %p1736_p5 }
  0x41   : > { %1746 = shalt.err (!%p1743_p4)
}
  0x42   : > { %s1747_s23 = scalar_lea.vmem %s1997_s6, 12288  ;;  %s1853_s28 = smov [#allocation6]  }
  0x43   : > { %p1748_p1 = scmp.ne.s32.totalorder %s1997_s6, %s1747_s23  ;;  %s1752_s4 = sshll.u32 %s1853_s28, 4  ;;  %s1753_s4 = int_to_ptr.vmem [resolvable:$false] %s1752_s4 }
  0x44   : > { %s1754_s5 = scalar_lea.vmem %s1753_s4, 24576  ;;  %p1755_p6 = scmp.lt.s32.totalorder %s1997_s6, %s1753_s4 }
  0x45   : > { %p1750_p10 = pnand %p1748_p1, %p1734_p12  ;;  %p1756_p0 = scmp.lt.s32.totalorder %s1754_s5, %s1747_s23 }
  0x47   : > { %p1751_p3 = pneg %p1750_p10  ;;  %p1757_p2 = por %p1756_p0, %p1755_p6 }
  0x49   : > { %p1758_p7 = pnand %p1757_p2, %p1751_p3 }
  0x4b   : > { %1761 = shalt.err (!%p1758_p7)
}
  0x4c   : > { %s1854_s24 = smov 512   ;;  %s1855_s15 = smov 256  }
  0x4d   : > { %s1856_s16 = smov 16   ;;  %p2313_p12 = scmp.ne.s32.totalorder %s2309_s22, 0 }
  0x4e   : > { %1637 = dma.hbm_to_vmem [thread:$0]  (!%p2312_p8), %s1992_s25, 12288, %s1997_s6, %s1999_s8, %s1854_s24, %s1855_s15, %s1856_s16  }
  0x4f   : > { %185 = sbr.rel (%p2313_p12) target bundleno = 514 (0x202), region = 28  ;;  %p2314_p5 = scmp.ne.s32.totalorder (!%p2313_p12), %s2304_s17, 0 }
  0x56   : > { %1815 = dma.done.wait (%p2314_p5), [#allocation4], 12288  }
  0x57   : > { %1817 = vsyncadd (%p2314_p5), [#allocation4], 4294955008  ;;  %s2034_s18 = sand.u32 1, %s1832_s10   ;;  %p2315_p8 = scmp.ne.s32.totalorder %s2306_s19, 0 }
  0x58   : > { %s1621_s30 = smul.u32 768, %s2034_s18  ;;  %s192_s29 = scalar_lea.sflag [#allocation7], %s2034_s18 }
  0x5a   : > { %s2038_s3 = scalar_lea.vmem [#allocation6], %s1621_s30 }
  0x5b   : > { %1819 = dma.done.wait (%p2315_p8), %s192_s29, 12288  }
  0x5c   : > { %1821 = vsyncadd (%p2315_p8), %s192_s29, 4294955008  ;;  %v1857_v0 = vmov 0.0   ;;  %v451_v1 = vld [vmem:[%s2038_s3 + $0x8] sm:$0xff]  ;;  %v453_v2 = vld [vmem:[%s2038_s3 + $0x18] sm:$0xff]  ;;  %s1452_s17 = sshll.u32 %s2034_s18, 9  ;;  %s1459_s22 = sshll.u32 %s1840_s12, 8 }
  0x5d   : > { %867 = vmatprep.mubr.f32.mxu0 %v1857_v0  ;;  %v450_v3 = vld [vmem:[%s2038_s3] sm:$0xff]  ;;  %v1460_v4 = vpack.c.bf16 %v453_v2, %v451_v1  ;;  %v452_v5 = vld [vmem:[%s2038_s3 + $0x10] sm:$0xff]  ;;  %v455_v6 = vld [vmem:[%s2038_s3 + $0x28] sm:$0xff]  ;;  %s2173_s19 = scalar_lea.vmem [#allocation8], %s1452_s17  ;;  %s2242_s8 = scalar_lea.hbm %s2297_s2, %s1459_s22 }
  0x5e   : > { %v457_v7 = vld [vmem:[%s2038_s3 + $0x38] sm:$0xff]  ;;  %v1462_v8 = vpack.c.bf16 %v452_v5, %v450_v3  ;;  %v454_v10 = vld [vmem:[%s2038_s3 + $0x20] sm:$0xff]  ;;  %v456_v11 = vld [vmem:[%s2038_s3 + $0x30] sm:$0xff]  ;;  %s1336_s26 = sshll.u32 %s2173_s19, 4  ;;  %s1320_s12 = scalar_lea.sflag [#allocation5], %s2034_s18  ;;  %s2244_s26 = int_to_ptr.vmem [resolvable:$true] %s1336_s26 }
  0x5f   : > { %v1464_v9 = vpack.c.bf16 %v457_v7, %v455_v6  ;;  %v459_v12 = vld [vmem:[%s2038_s3 + $0x48] sm:$0xff]  ;;  %1461 = vmatprep.subr.bf16.mxu1 %v1460_v4  ;;  %v461_v13 = vld [vmem:[%s2038_s3 + $0x58] sm:$0xff]  ;;  %v1466_v14 = vpack.c.bf16 %v456_v11, %v454_v10  ;;  %v458_v16 = vld [vmem:[%s2038_s3 + $0x40] sm:$0xff]  ;;  %s1762_s23 = scalar_lea.vmem %s2244_s26, 8192  ;;  %p2316_p11 = scmp.ne.s32.totalorder %s2307_s20, 0 }
  0x60   : > { %1463 = vmatpush1.bf16.msra.mxu1 %v1462_v8  ;;  %v1468_v15 = vpack.c.bf16 %v461_v13, %v459_v12  ;;  %v460_v17 = vld [vmem:[%s2038_s3 + $0x50] sm:$0xff]  ;;  %v463_v18 = vld [vmem:[%s2038_s3 + $0x68] sm:$0xff]  ;;  %v465_v19 = vld [vmem:[%s2038_s3 + $0x78] sm:$0xff]  ;;  %p1763_p9 = scmp.ne.s32.totalorder %s2244_s26, %s1762_s23  ;;  %s1858_s28 = smov [#allocation8]  }
  0x61   : > { %1465 = vmatprep.subr.bf16.mxu1 %v1464_v9  ;;  %v1470_v20 = vpack.c.bf16 %v460_v17, %v458_v16  ;;  %v1472_v21 = vpack.c.bf16 %v465_v19, %v463_v18  ;;  %v462_v22 = vld [vmem:[%s2038_s3 + $0x60] sm:$0xff]  ;;  %v464_v23 = vld [vmem:[%s2038_s3 + $0x70] sm:$0xff]  ;;  %v467_v24 = vld [vmem:[%s2038_s3 + $0x88] sm:$0xff]  ;;  %s1766_s4 = sshll.u32 %s1858_s28, 4  ;;  %s1767_s4 = int_to_ptr.vmem [resolvable:$false] %s1766_s4 }
  0x62   : > { %v469_v25 = vld [vmem:[%s2038_s3 + $0x98] sm:$0xff]  ;;  %v515_v26 = vld [vmem:[%s2038_s3 + $0x208] sm:$0xff]  ;;  %v1474_v28 = vpack.c.bf16 %v464_v23, %v462_v22  ;;  %v466_v29 = vld [vmem:[%s2038_s3 + $0x80] sm:$0xff]  ;;  %p1764_p13 = pnand %p1763_p9, %p2316_p11  ;;  %s1768_s5 = scalar_lea.vmem %s1767_s4, 16384 }
  0x63   : > { %v517_v27 = vld [vmem:[%s2038_s3 + $0x218] sm:$0xff]  ;;  %v514_v31 = vld [vmem:[%s2038_s3 + $0x200] sm:$0xff]  ;;  %v516_v32 = vld [vmem:[%s2038_s3 + $0x210] sm:$0xff]  ;;  %v1476_v33 = vpack.c.bf16 %v469_v25, %v467_v24  ;;  %p1769_p1 = scmp.lt.s32.totalorder %s2244_s26, %s1767_s4  ;;  %p1770_p10 = scmp.lt.s32.totalorder %s1768_s5, %s1762_s23 }
  0x64   : > { %1467 = vmatpush1.bf16.msra.mxu1 %v1466_v14  ;;  %v1524_v30 = vpack.c.bf16 %v517_v27, %v515_v26  ;;  %v468_v34 = vld [vmem:[%s2038_s3 + $0x90] sm:$0xff]  ;;  %v1526_v35 = vpack.c.bf16 %v516_v32, %v514_v31  ;;  %v519_v36 = vld [vmem:[%s2038_s3 + $0x228] sm:$0xff]  ;;  %v521_v37 = vld [vmem:[%s2038_s3 + $0x238] sm:$0xff]  ;;  %p1765_p4 = pneg %p1764_p13 }
  0x65   : > { %1469 = vmatprep.subr.bf16.mxu1 %v1468_v15  ;;  %v471_v38 = vld [vmem:[%s2038_s3 + $0xa8] sm:$0xff]  ;;  %v473_v39 = vld [vmem:[%s2038_s3 + $0xb8] sm:$0xff]  ;;  %v1528_v40 = vpack.c.bf16 %v521_v37, %v519_v36  ;;  %v518_v41 = vld [vmem:[%s2038_s3 + $0x220] sm:$0xff]  ;;  %v1478_v43 = vpack.c.bf16 %v468_v34, %v466_v29  ;;  %p1771_p3 = por %p1770_p10, %p1769_p1 }
  0x66   : > { %1525 = vmatprep.subr.bf16.mxu0 %v1524_v30  ;;  %v520_v42 = vld [vmem:[%s2038_s3 + $0x230] sm:$0xff]  ;;  %v470_v44 = vld [vmem:[%s2038_s3 + $0xa0] sm:$0xff]  ;;  %v523_v46 = vld [vmem:[%s2038_s3 + $0x248] sm:$0xff]  ;;  %v1480_v48 = vpack.c.bf16 %v473_v39, %v471_v38 }
  0x67   : > { %1527 = vmatpush1.bf16.msra.mxu0 %v1526_v35  ;;  %v1530_v45 = vpack.c.bf16 %v520_v42, %v518_v41  ;;  %v525_v47 = vld [vmem:[%s2038_s3 + $0x258] sm:$0xff]  ;;  %v472_v49 = vld [vmem:[%s2038_s3 + $0xb0] sm:$0xff]  ;;  %v522_v51 = vld [vmem:[%s2038_s3 + $0x240] sm:$0xff]  ;;  %p1772_p6 = pnand %p1771_p3, %p1765_p4 }
  0x68   : > { %1471 = vmatpush1.bf16.msra.mxu1 %v1470_v20  ;;  %1529 = vmatprep.subr.bf16.mxu0 %v1528_v40  ;;  %v1532_v50 = vpack.c.bf16 %v525_v47, %v523_v46  ;;  %v524_v52 = vld [vmem:[%s2038_s3 + $0x250] sm:$0xff]  ;;  %v475_v53 = vld [vmem:[%s2038_s3 + $0xc8] sm:$0xff]  ;;  %v477_v54 = vld [vmem:[%s2038_s3 + $0xd8] sm:$0xff]  ;;  %v1482_v58 = vpack.c.bf16 %v472_v49, %v470_v44 }
  0x69   : > { %1473 = vmatprep.subr.bf16.mxu1 %v1472_v21  ;;  %v527_v55 = vld [vmem:[%s2038_s3 + $0x268] sm:$0xff]  ;;  %v1534_v56 = vpack.c.bf16 %v524_v52, %v522_v51  ;;  %v529_v57 = vld [vmem:[%s2038_s3 + $0x278] sm:$0xff]  ;;  %v474_v59 = vld [vmem:[%s2038_s3 + $0xc0] sm:$0xff]  ;;  %v1484_v63 = vpack.c.bf16 %v477_v54, %v475_v53 }
  0x6a   : > { %v1536_v60 = vpack.c.bf16 %v529_v57, %v527_v55  ;;  %v526_v61 = vld [vmem:[%s2038_s3 + $0x260] sm:$0xff]  ;;  %v528_v62 = vld [vmem:[%s2038_s3 + $0x270] sm:$0xff]  ;;  %v531_v2 = vld [vmem:[%s2038_s3 + $0x288] sm:$0xff] }
  0x6b   : > { %1531 = vmatpush1.bf16.msra.mxu0 %v1530_v45  ;;  %v476_v1 = vld [vmem:[%s2038_s3 + $0xd0] sm:$0xff]  ;;  %v533_v3 = vld [vmem:[%s2038_s3 + $0x298] sm:$0xff]  ;;  %v479_v4 = vld [vmem:[%s2038_s3 + $0xe8] sm:$0xff]  ;;  %v1538_v6 = vpack.c.bf16 %v528_v62, %v526_v61 }
  0x6c   : > { %1475 = vmatpush1.bf16.msra.mxu1 %v1474_v28  ;;  %1533 = vmatprep.subr.bf16.mxu0 %v1532_v50  ;;  %v481_v5 = vld [vmem:[%s2038_s3 + $0xf8] sm:$0xff]  ;;  %v1486_v7 = vpack.c.bf16 %v476_v1, %v474_v59  ;;  %v478_v8 = vld [vmem:[%s2038_s3 + $0xe0] sm:$0xff]  ;;  %v1540_v9 = vpack.c.bf16 %v533_v3, %v531_v2  ;;  %v532_v11 = vld [vmem:[%s2038_s3 + $0x290] sm:$0xff] }
  0x6d   : > { %1477 = vmatprep.subr.bf16.mxu1 %v1476_v33  ;;  %v530_v10 = vld [vmem:[%s2038_s3 + $0x280] sm:$0xff]  ;;  %v1488_v12 = vpack.c.bf16 %v481_v5, %v479_v4  ;;  %v480_v13 = vld [vmem:[%s2038_s3 + $0xf0] sm:$0xff]  ;;  %v535_v14 = vld [vmem:[%s2038_s3 + $0x2a8] sm:$0xff] }
  0x6e   : > { %v537_v15 = vld [vmem:[%s2038_s3 + $0x2b8] sm:$0xff]  ;;  %v483_v16 = vld [vmem:[%s2038_s3 + $0x108] sm:$0xff]  ;;  %v1542_v18 = vpack.c.bf16 %v532_v11, %v530_v10  ;;  %v1490_v19 = vpack.c.bf16 %v480_v13, %v478_v8  ;;  %v482_v20 = vld [vmem:[%s2038_s3 + $0x100] sm:$0xff] }
  0x6f   : > { %1535 = vmatpush1.bf16.msra.mxu0 %v1534_v56  ;;  %v485_v17 = vld [vmem:[%s2038_s3 + $0x118] sm:$0xff]  ;;  %v1544_v21 = vpack.c.bf16 %v537_v15, %v535_v14  ;;  %v534_v22 = vld [vmem:[%s2038_s3 + $0x2a0] sm:$0xff]  ;;  %v536_v23 = vld [vmem:[%s2038_s3 + $0x2b0] sm:$0xff] }
  0x70   : > { %1479 = vmatpush1.bf16.msra.mxu1 %v1478_v43  ;;  %1537 = vmatprep.subr.bf16.mxu0 %v1536_v60  ;;  %v1492_v24 = vpack.c.bf16 %v485_v17, %v483_v16  ;;  %v484_v25 = vld [vmem:[%s2038_s3 + $0x110] sm:$0xff]  ;;  %v539_v26 = vld [vmem:[%s2038_s3 + $0x2c8] sm:$0xff]  ;;  %v541_v27 = vld [vmem:[%s2038_s3 + $0x2d8] sm:$0xff]  ;;  %v1546_v31 = vpack.c.bf16 %v536_v23, %v534_v22 }
  0x71   : > { %1481 = vmatprep.subr.bf16.mxu1 %v1480_v48  ;;  %v487_v28 = vld [vmem:[%s2038_s3 + $0x128] sm:$0xff]  ;;  %v489_v29 = vld [vmem:[%s2038_s3 + $0x138] sm:$0xff]  ;;  %v486_v30 = vld [vmem:[%s2038_s3 + $0x120] sm:$0xff]  ;;  %v1494_v32 = vpack.c.bf16 %v484_v25, %v482_v20  ;;  %v1548_v33 = vpack.c.bf16 %v541_v27, %v539_v26 }
  0x72   : > { %v538_v34 = vld [vmem:[%s2038_s3 + $0x2c0] sm:$0xff]  ;;  %v540_v35 = vld [vmem:[%s2038_s3 + $0x2d0] sm:$0xff]  ;;  %v355_v36 = vld [vmem:[#allocation3 + $0x8] sm:$0xff]  ;;  %v1496_v37 = vpack.c.bf16 %v489_v29, %v487_v28 }
  0x73   : > { %1539 = vmatpush1.bf16.msra.mxu0 %v1538_v6  ;;  %v488_v38 = vld [vmem:[%s2038_s3 + $0x130] sm:$0xff]  ;;  %v543_v39 = vld [vmem:[%s2038_s3 + $0x2e8] sm:$0xff]  ;;  %v545_v40 = vld [vmem:[%s2038_s3 + $0x2f8] sm:$0xff]  ;;  %610 = vmatprep.mubr.f32.mxu1 %v355_v36  ;;  %v1550_v43 = vpack.c.bf16 %v540_v35, %v538_v34 }
  0x74   : > { %1483 = vmatpush1.bf16.msra.mxu1 %v1482_v58  ;;  %1541 = vmatprep.subr.bf16.mxu0 %v1540_v9  ;;  %v491_v41 = vld [vmem:[%s2038_s3 + $0x148] sm:$0xff]  ;;  %v493_v42 = vld [vmem:[%s2038_s3 + $0x158] sm:$0xff]  ;;  %v1498_v44 = vpack.c.bf16 %v488_v38, %v486_v30  ;;  %v1552_v45 = vpack.c.bf16 %v545_v40, %v543_v39  ;;  %v542_v46 = vld [vmem:[%s2038_s3 + $0x2e0] sm:$0xff] }
  0x75   : > { %1485 = vmatprep.subr.bf16.mxu1 %v1484_v63  ;;  %v544_v47 = vld [vmem:[%s2038_s3 + $0x2f0] sm:$0xff]  ;;  %v1500_v48 = vpack.c.bf16 %v493_v42, %v491_v41  ;;  %v490_v49 = vld [vmem:[%s2038_s3 + $0x140] sm:$0xff]  ;;  %v495_v51 = vld [vmem:[%s2038_s3 + $0x168] sm:$0xff] }
  0x76   : > { %v492_v50 = vld [vmem:[%s2038_s3 + $0x150] sm:$0xff]  ;;  %v497_v52 = vld [vmem:[%s2038_s3 + $0x178] sm:$0xff]  ;;  %v1554_v53 = vpack.c.bf16 %v544_v47, %v542_v46  ;;  %v494_v56 = vld [vmem:[%s2038_s3 + $0x160] sm:$0xff] }
  0x77   : > { %1543 = vmatpush1.bf16.msra.mxu0 %v1542_v18  ;;  %v1502_v54 = vpack.c.bf16 %v492_v50, %v490_v49  ;;  %v1504_v55 = vpack.c.bf16 %v497_v52, %v495_v51  ;;  %v496_v57 = vld [vmem:[%s2038_s3 + $0x170] sm:$0xff]  ;;  %v499_v58 = vld [vmem:[%s2038_s3 + $0x188] sm:$0xff]  ;;  %v501_v59 = vld [vmem:[%s2038_s3 + $0x198] sm:$0xff] }
  0x78   : > { %1487 = vmatpush1.bf16.msra.mxu1 %v1486_v7  ;;  %1545 = vmatprep.subr.bf16.mxu0 %v1544_v21  ;;  %v356_v60 = vld [vmem:[#allocation3 + $0x10] sm:$0xff]  ;;  %v1506_v61 = vpack.c.bf16 %v496_v57, %v494_v56  ;;  %v1508_v62 = vpack.c.bf16 %v501_v59, %v499_v58  ;;  %v498_v63 = vld [vmem:[%s2038_s3 + $0x180] sm:$0xff]  ;;  %v503_v2 = vld [vmem:[%s2038_s3 + $0x1a8] sm:$0xff] }
  0x79   : > { %1489 = vmatprep.subr.bf16.mxu1 %v1488_v12  ;;  %v500_v1 = vld [vmem:[%s2038_s3 + $0x190] sm:$0xff]  ;;  %v505_v3 = vld [vmem:[%s2038_s3 + $0x1b8] sm:$0xff]  ;;  %v359_v4 = vld [vmem:[#allocation3 + $0x28] sm:$0xff] }
  0x7a   : > { %v1510_v5 = vpack.c.bf16 %v500_v1, %v498_v63  ;;  %v1512_v6 = vpack.c.bf16 %v505_v3, %v503_v2  ;;  %v502_v7 = vld [vmem:[%s2038_s3 + $0x1a0] sm:$0xff]  ;;  %v504_v8 = vld [vmem:[%s2038_s3 + $0x1b0] sm:$0xff]  ;;  %v507_v9 = vld [vmem:[%s2038_s3 + $0x1c8] sm:$0xff] }
  0x7b   : > { %1547 = vmatpush1.bf16.msra.mxu0 %v1546_v31  ;;  %v509_v10 = vld [vmem:[%s2038_s3 + $0x1d8] sm:$0xff]  ;;  %v362_v11 = vld [vmem:[#allocation3 + $0x40] sm:$0xff]  ;;  %v1514_v12 = vpack.c.bf16 %v504_v8, %v502_v7  ;;  %v508_v15 = vld [vmem:[%s2038_s3 + $0x1d0] sm:$0xff] }
  0x7c   : > { %1491 = vmatpush1.bf16.msra.mxu1 %v1490_v19  ;;  %1549 = vmatprep.subr.bf16.mxu0 %v1548_v33  ;;  %v1516_v13 = vpack.c.bf16 %v509_v10, %v507_v9  ;;  %v506_v14 = vld [vmem:[%s2038_s3 + $0x1c0] sm:$0xff]  ;;  %v511_v16 = vld [vmem:[%s2038_s3 + $0x1e8] sm:$0xff]  ;;  %v513_v17 = vld [vmem:[%s2038_s3 + $0x1f8] sm:$0xff] }
  0x7d   : > { %1493 = vmatprep.subr.bf16.mxu1 %v1492_v24  ;;  %v365_v18 = vld [vmem:[#allocation3 + $0x58] sm:$0xff]  ;;  %v1518_v19 = vpack.c.bf16 %v508_v15, %v506_v14  ;;  %v1520_v20 = vpack.c.bf16 %v513_v17, %v511_v16  ;;  %v510_v21 = vld [vmem:[%s2038_s3 + $0x1e0] sm:$0xff]  ;;  %v512_v22 = vld [vmem:[%s2038_s3 + $0x1f0] sm:$0xff] }
  0x7e   : > { %v368_v23 = vld [vmem:[#allocation3 + $0x70] sm:$0xff]  ;;  %v1522_v24 = vpack.c.bf16 %v512_v22, %v510_v21  ;;  %v371_v25 = vld [vmem:[#allocation3 + $0x88] sm:$0xff]  ;;  %v354_v26 = vld [vmem:[#allocation3] sm:$0xff] }
  0x7f   : > { %1551 = vmatpush1.bf16.msra.mxu0 %v1550_v43  ;;  %v358_v27 = vld [vmem:[#allocation3 + $0x20] sm:$0xff]  ;;  %v357_v29 = vld [vmem:[#allocation3 + $0x18] sm:$0xff]  ;;  %v364_v33 = vld [vmem:[#allocation3 + $0x50] sm:$0xff] }
  0x80   : > { %1495 = vmatpush1.bf16.msra.mxu1 %v1494_v32  ;;  %1553 = vmatprep.subr.bf16.mxu0 %v1552_v45  ;;  %v374_v28 = vld [vmem:[#allocation3 + $0xa0] sm:$0xff]  ;;  %v361_v30 = vld [vmem:[#allocation3 + $0x38] sm:$0xff]  ;;  %v360_v32 = vld [vmem:[#allocation3 + $0x30] sm:$0xff] }
  0x81   : > { %1497 = vmatprep.subr.bf16.mxu1 %v1496_v37  ;;  %v377_v31 = vld [vmem:[#allocation3 + $0xb8] sm:$0xff]  ;;  %v380_v34 = vld [vmem:[#allocation3 + $0xd0] sm:$0xff]  ;;  %v363_v35 = vld [vmem:[#allocation3 + $0x48] sm:$0xff] }
  0x82   : > { %v367_v36 = vld [vmem:[#allocation3 + $0x68] sm:$0xff]  ;;  %v366_v38 = vld [vmem:[#allocation3 + $0x60] sm:$0xff]  ;;  %v369_v41 = vld [vmem:[#allocation3 + $0x78] sm:$0xff] }
  0x83   : > { %1555 = vmatpush1.bf16.msra.mxu0 %v1554_v53  ;;  %v383_v37 = vld [vmem:[#allocation3 + $0xe8] sm:$0xff]  ;;  %v370_v39 = vld [vmem:[#allocation3 + $0x80] sm:$0xff]  ;;  %v373_v42 = vld [vmem:[#allocation3 + $0x98] sm:$0xff] }
  0x84   : > { %1499 = vmatpush1.bf16.msra.mxu1 %v1498_v44  ;;  %v386_v40 = vld [vmem:[#allocation3 + $0x100] sm:$0xff]  ;;  %v389_v43 = vld [vmem:[#allocation3 + $0x118] sm:$0xff]  ;;  %v372_v44 = vld [vmem:[#allocation3 + $0x90] sm:$0xff] }
  0x85   : > { %1501 = vmatprep.subr.bf16.mxu1 %v1500_v48  ;;  %v376_v45 = vld [vmem:[#allocation3 + $0xb0] sm:$0xff]  ;;  %v375_v47 = vld [vmem:[#allocation3 + $0xa8] sm:$0xff]  ;;  %v378_v50 = vld [vmem:[#allocation3 + $0xc0] sm:$0xff] }
  0x86   : > { %868 = vmatmul.mubr.f32.vlgmr.msra.gmra.mrb[0].mxu0 %v356_v60  ;;  %v392_v46 = vld [vmem:[#allocation3 + $0x130] sm:$0xff]  ;;  %v379_v48 = vld [vmem:[#allocation3 + $0xc8] sm:$0xff]  ;;  %v382_v51 = vld [vmem:[#allocation3 + $0xe0] sm:$0xff] }
  0x87   : > { %873 = vmatprep.mubr.f32.mxu0 %v1857_v0  ;;  %v395_v49 = vld [vmem:[#allocation3 + $0x148] sm:$0xff]  ;;  %v398_v52 = vld [vmem:[#allocation3 + $0x160] sm:$0xff]  ;;  %v381_v53 = vld [vmem:[#allocation3 + $0xd8] sm:$0xff] }
  0x88   : > { %1503 = vmatpush1.bf16.msra.mxu1 %v1502_v54  ;;  %v385_v54 = vld [vmem:[#allocation3 + $0xf8] sm:$0xff]  ;;  %v384_v56 = vld [vmem:[#allocation3 + $0xf0] sm:$0xff]  ;;  %v387_v59 = vld [vmem:[#allocation3 + $0x108] sm:$0xff] }
  0x89   : > { %1505 = vmatprep.subr.bf16.mxu1 %v1504_v55  ;;  %v401_v55 = vld [vmem:[#allocation3 + $0x178] sm:$0xff]  ;;  %v388_v57 = vld [vmem:[#allocation3 + $0x110] sm:$0xff]  ;;  %v391_v60 = vld [vmem:[#allocation3 + $0x128] sm:$0xff] }
  0x8a   : > { %874 = vmatmul.mubr.f32.gmra.mrb[2].mxu0 %v359_v4  ;;  %v404_v58 = vld [vmem:[#allocation3 + $0x190] sm:$0xff]  ;;  %v394_v63 = vld [vmem:[#allocation3 + $0x140] sm:$0xff]  ;;  %v393_v2 = vld [vmem:[#allocation3 + $0x138] sm:$0xff] }
  0x8b   : > { %879 = vmatprep.mubr.f32.mxu0 %v1857_v0  ;;  %v410_v1 = vld [vmem:[#allocation3 + $0x1c0] sm:$0xff]  ;;  %v397_v3 = vld [vmem:[#allocation3 + $0x158] sm:$0xff]  ;;  %v416_v7 = vld [vmem:[#allocation3 + $0x1f0] sm:$0xff] }
  0x8c   : > { %1507 = vmatpush1.bf16.msra.mxu1 %v1506_v61  ;;  %v407_v61 = vld [vmem:[#allocation3 + $0x1a8] sm:$0xff]  ;;  %v413_v4 = vld [vmem:[#allocation3 + $0x1d8] sm:$0xff]  ;;  %v408_v17 = vld [vmem:[#allocation3 + $0x1b0] sm:$0xff] }
  0x8d   : > { %1509 = vmatprep.subr.bf16.mxu1 %v1508_v62  ;;  %v390_v62 = vld [vmem:[#allocation3 + $0x120] sm:$0xff]  ;;  %v399_v8 = vld [vmem:[#allocation3 + $0x168] sm:$0xff]  ;;  %v405_v14 = vld [vmem:[#allocation3 + $0x198] sm:$0xff] }
  0x8e   : > { %880 = vmatmul.mubr.f32.gmra.mrb[4].mxu0 %v362_v11  ;;  %v403_v9 = vld [vmem:[#allocation3 + $0x188] sm:$0xff]  ;;  %v402_v11 = vld [vmem:[#allocation3 + $0x180] sm:$0xff]  ;;  %v409_v15 = vld [vmem:[#allocation3 + $0x1b8] sm:$0xff] }
  0x8f   : > { %885 = vmatprep.mubr.f32.mxu0 %v1857_v0  ;;  %v419_v10 = vld [vmem:[#allocation3 + $0x208] sm:$0xff]  ;;  %v425_v16 = vld [vmem:[#allocation3 + $0x238] sm:$0xff] }
  0x90   : > { %1511 = vmatpush1.bf16.msra.mxu1 %v1510_v5  ;;  %v396_v5 = vld [vmem:[#allocation3 + $0x150] sm:$0xff]  ;;  %v415_v21 = vld [vmem:[#allocation3 + $0x1e8] sm:$0xff] }
  0x91   : > { %1513 = vmatprep.subr.bf16.mxu1 %v1512_v6  ;;  %v400_v6 = vld [vmem:[#allocation3 + $0x170] sm:$0xff]  ;;  %v431_v22 = vld [vmem:[#allocation3 + $0x268] sm:$0xff] }
  0x92   : > { %886 = vmatmul.mubr.f32.gmra.mrb[6].mxu0 %v365_v18  ;;  %v412_v18 = vld [vmem:[#allocation3 + $0x1d0] sm:$0xff] }
  0x93   : > { %891 = vmatprep.mubr.f32.mxu0 %v1857_v0 }
  0x94   : > { %1515 = vmatpush1.bf16.msra.mxu1 %v1514_v12  ;;  %v406_v12 = vld [vmem:[#allocation3 + $0x1a0] sm:$0xff] }
  0x95   : > { %1517 = vmatprep.subr.bf16.mxu1 %v1516_v13  ;;  %v422_v13 = vld [vmem:[#allocation3 + $0x220] sm:$0xff] }
  0x96   : > { %892 = vmatmul.mubr.f32.gmra.mrb[8].mxu0 %v368_v23  ;;  %v414_v23 = vld [vmem:[#allocation3 + $0x1e0] sm:$0xff] }
  0x97   : > { %897 = vmatprep.mubr.f32.mxu0 %v1857_v0 }
  0x98   : > { %1519 = vmatpush1.bf16.msra.mxu1 %v1518_v19  ;;  %v428_v19 = vld [vmem:[#allocation3 + $0x250] sm:$0xff] }
  0x99   : > { %1521 = vmatprep.subr.bf16.mxu1 %v1520_v20  ;;  %v411_v20 = vld [vmem:[#allocation3 + $0x1c8] sm:$0xff] }
  0x9a   : > { %898 = vmatmul.mubr.f32.gmra.mrb[10].mxu0 %v371_v25  ;;  %v434_v25 = vld [vmem:[#allocation3 + $0x280] sm:$0xff] }
  0x9b   : > { %903 = vmatprep.mubr.f32.mxu0 %v1857_v0 }
  0x9c   : > { %1523 = vmatpush1.bf16.msra.mxu1 %v1522_v24  ;;  %v418_v24 = vld [vmem:[#allocation3 + $0x200] sm:$0xff] }
  0x9e   : > { %904 = vmatmul.mubr.f32.gmra.mrb[12].mxu0 %v374_v28  ;;  %v437_v28 = vld [vmem:[#allocation3 + $0x298] sm:$0xff] }
  0x9f   : > { %611 = vmatmul.mubr.f32.vlgmr.msra.gmra.mrb[0].mxu1 %v354_v26  ;;  %909 = vmatprep.mubr.f32.mxu0 %v1857_v0  ;;  %v417_v26 = vld [vmem:[#allocation3 + $0x1f8] sm:$0xff] }
  0xa0   : > { %616 = vmatprep.mubr.f32.mxu1 %v358_v27  ;;  %v421_v27 = vld [vmem:[#allocation3 + $0x218] sm:$0xff] }
  0xa2   : > { %910 = vmatmul.mubr.f32.gmra.mrb[14].mxu0 %v377_v31  ;;  %v440_v31 = vld [vmem:[#allocation3 + $0x2b0] sm:$0xff] }
  0xa3   : > { %617 = vmatmul.mubr.f32.gmra.mrb[2].mxu1 %v357_v29  ;;  %915 = vmatprep.mubr.f32.mxu0 %v1857_v0  ;;  %v420_v29 = vld [vmem:[#allocation3 + $0x210] sm:$0xff] }
  0xa4   : > { %622 = vmatprep.mubr.f32.mxu1 %v361_v30  ;;  %v424_v30 = vld [vmem:[#allocation3 + $0x230] sm:$0xff] }
  0xa6   : > { %916 = vmatmul.mubr.f32.gmra.mrb[16].mxu0 %v380_v34  ;;  %v443_v34 = vld [vmem:[#allocation3 + $0x2c8] sm:$0xff] }
  0xa7   : > { %623 = vmatmul.mubr.f32.gmra.mrb[4].mxu1 %v360_v32  ;;  %921 = vmatprep.mubr.f32.mxu0 %v1857_v0  ;;  %v423_v32 = vld [vmem:[#allocation3 + $0x228] sm:$0xff] }
  0xa8   : > { %628 = vmatprep.mubr.f32.mxu1 %v364_v33  ;;  %v427_v33 = vld [vmem:[#allocation3 + $0x248] sm:$0xff] }
  0xaa   : > { %922 = vmatmul.mubr.f32.gmra.mrb[18].mxu0 %v383_v37  ;;  %v446_v37 = vld [vmem:[#allocation3 + $0x2e0] sm:$0xff] }
  0xab   : > { %629 = vmatmul.mubr.f32.gmra.mrb[6].mxu1 %v363_v35  ;;  %927 = vmatprep.mubr.f32.mxu0 %v1857_v0  ;;  %v426_v35 = vld [vmem:[#allocation3 + $0x240] sm:$0xff] }
  0xac   : > { %634 = vmatprep.mubr.f32.mxu1 %v367_v36  ;;  %v430_v36 = vld [vmem:[#allocation3 + $0x260] sm:$0xff] }
  0xae   : > { %928 = vmatmul.mubr.f32.gmra.mrb[20].mxu0 %v386_v40  ;;  %v449_v40 = vld [vmem:[#allocation3 + $0x2f8] sm:$0xff] }
  0xaf   : > { %635 = vmatmul.mubr.f32.gmra.mrb[8].mxu1 %v366_v38  ;;  %933 = vmatprep.mubr.f32.mxu0 %v1857_v0  ;;  %v429_v38 = vld [vmem:[#allocation3 + $0x258] sm:$0xff] }
  0xb0   : > { %640 = vmatprep.mubr.f32.mxu1 %v370_v39  ;;  %v433_v39 = vld [vmem:[#allocation3 + $0x278] sm:$0xff] }
  0xb2   : > { %934 = vmatmul.mubr.f32.gmra.mrb[22].mxu0 %v389_v43  ;;  %v435_v43 = vld [vmem:[#allocation3 + $0x288] sm:$0xff] }
  0xb3   : > { %641 = vmatmul.mubr.f32.gmra.mrb[10].mxu1 %v369_v41  ;;  %939 = vmatprep.mubr.f32.mxu0 %v1857_v0  ;;  %v432_v41 = vld [vmem:[#allocation3 + $0x270] sm:$0xff] }
  0xb4   : > { %646 = vmatprep.mubr.f32.mxu1 %v373_v42  ;;  %v436_v42 = vld [vmem:[#allocation3 + $0x290] sm:$0xff] }
  0xb6   : > { %940 = vmatmul.mubr.f32.gmra.mrb[24].mxu0 %v392_v46  ;;  %v442_v46 = vld [vmem:[#allocation3 + $0x2c0] sm:$0xff] }
  0xb7   : > { %647 = vmatmul.mubr.f32.gmra.mrb[12].mxu1 %v372_v44  ;;  %945 = vmatprep.mubr.f32.mxu0 %v1857_v0  ;;  %v439_v44 = vld [vmem:[#allocation3 + $0x2a8] sm:$0xff] }
  0xb8   : > { %652 = vmatprep.mubr.f32.mxu1 %v376_v45  ;;  %v438_v45 = vld [vmem:[#allocation3 + $0x2a0] sm:$0xff] }
  0xba   : > { %946 = vmatmul.mubr.f32.gmra.mrb[26].mxu0 %v395_v49  ;;  %v448_v49 = vld [vmem:[#allocation3 + $0x2f0] sm:$0xff] }
  0xbb   : > { %653 = vmatmul.mubr.f32.gmra.mrb[14].mxu1 %v375_v47  ;;  %951 = vmatprep.mubr.f32.mxu0 %v1857_v0  ;;  %v441_v47 = vld [vmem:[#allocation3 + $0x2b8] sm:$0xff] }
  0xbc   : > { %658 = vmatprep.mubr.f32.mxu1 %v379_v48  ;;  %v445_v48 = vld [vmem:[#allocation3 + $0x2d8] sm:$0xff] }
  0xbe   : > { %952 = vmatmul.mubr.f32.gmra.mrb[28].mxu0 %v398_v52 }
  0xbf   : > { %659 = vmatmul.mubr.f32.gmra.mrb[16].mxu1 %v378_v50  ;;  %957 = vmatprep.mubr.f32.mxu0 %v1857_v0  ;;  %v447_v50 = vld [vmem:[#allocation3 + $0x2e8] sm:$0xff] }
  0xc0   : > { %664 = vmatprep.mubr.f32.mxu1 %v382_v51 }
  0xc2   : > { %958 = vmatmul.mubr.f32.gmra.mrb[30].mxu0 %v401_v55 }
  0xc3   : > { %665 = vmatmul.mubr.f32.gmra.mrb[18].mxu1 %v381_v53  ;;  %963 = vmatprep.mubr.f32.mxu0 %v1857_v0 }
  0xc4   : > { %670 = vmatprep.mubr.f32.mxu1 %v385_v54 }
  0xc6   : > { %964 = vmatmul.mubr.f32.gmra.mrb[32].mxu0 %v404_v58 }
  0xc7   : > { %671 = vmatmul.mubr.f32.gmra.mrb[20].mxu1 %v384_v56  ;;  %969 = vmatprep.mubr.f32.mxu0 %v1857_v0 }
  0xc8   : > { %676 = vmatprep.mubr.f32.mxu1 %v388_v57 }
  0xca   : > { %970 = vmatmul.mubr.f32.gmra.mrb[34].mxu0 %v407_v61 }
  0xcb   : > { %677 = vmatmul.mubr.f32.gmra.mrb[22].mxu1 %v387_v59  ;;  %975 = vmatprep.mubr.f32.mxu0 %v1857_v0 }
  0xcc   : > { %682 = vmatprep.mubr.f32.mxu1 %v391_v60 }
  0xce   : > { %976 = vmatmul.mubr.f32.gmra.mrb[36].mxu0 %v410_v1 }
  0xcf   : > { %683 = vmatmul.mubr.f32.gmra.mrb[24].mxu1 %v390_v62  ;;  %981 = vmatprep.mubr.f32.mxu0 %v1857_v0 }
  0xd0   : > { %688 = vmatprep.mubr.f32.mxu1 %v394_v63 }
  0xd2   : > { %982 = vmatmul.mubr.f32.gmra.mrb[38].mxu0 %v413_v4 }
  0xd3   : > { %689 = vmatmul.mubr.f32.gmra.mrb[26].mxu1 %v393_v2  ;;  %987 = vmatprep.mubr.f32.mxu0 %v1857_v0 }
  0xd4   : > { %694 = vmatprep.mubr.f32.mxu1 %v397_v3 }
  0xd6   : > { %988 = vmatmul.mubr.f32.gmra.mrb[40].mxu0 %v416_v7 }
  0xd7   : > { %695 = vmatmul.mubr.f32.gmra.mrb[28].mxu1 %v396_v5  ;;  %993 = vmatprep.mubr.f32.mxu0 %v1857_v0 }
  0xd8   : > { %700 = vmatprep.mubr.f32.mxu1 %v400_v6 }
  0xda   : > { %994 = vmatmul.mubr.f32.gmra.mrb[42].mxu0 %v419_v10 }
  0xdb   : > { %701 = vmatmul.mubr.f32.gmra.mrb[30].mxu1 %v399_v8  ;;  %999 = vmatprep.mubr.f32.mxu0 %v1857_v0 }
  0xdc   : > { %706 = vmatprep.mubr.f32.mxu1 %v403_v9 }
  0xde   : > { %1000 = vmatmul.mubr.f32.gmra.mrb[44].mxu0 %v422_v13 }
  0xdf   : > { %707 = vmatmul.mubr.f32.gmra.mrb[32].mxu1 %v402_v11  ;;  %1005 = vmatprep.mubr.f32.mxu0 %v1857_v0 }
  0xe0   : > { %712 = vmatprep.mubr.f32.mxu1 %v406_v12 }
  0xe2   : > { %1006 = vmatmul.mubr.f32.gmra.mrb[46].mxu0 %v425_v16 }
  0xe3   : > { %713 = vmatmul.mubr.f32.gmra.mrb[34].mxu1 %v405_v14  ;;  %1011 = vmatprep.mubr.f32.mxu0 %v1857_v0 }
  0xe4   : > { %718 = vmatprep.mubr.f32.mxu1 %v409_v15 }
  0xe6   : > { %1012 = vmatmul.mubr.f32.gmra.mrb[48].mxu0 %v428_v19 }
  0xe7   : > { %719 = vmatmul.mubr.f32.gmra.mrb[36].mxu1 %v408_v17  ;;  %1017 = vmatprep.mubr.f32.mxu0 %v1857_v0 }
  0xe8   : > { %724 = vmatprep.mubr.f32.mxu1 %v412_v18 }
  0xea   : > { %1018 = vmatmul.mubr.f32.gmra.mrb[50].mxu0 %v431_v22 }
  0xeb   : > { %725 = vmatmul.mubr.f32.gmra.mrb[38].mxu1 %v411_v20  ;;  %1023 = vmatprep.mubr.f32.mxu0 %v1857_v0 }
  0xec   : > { %730 = vmatprep.mubr.f32.mxu1 %v415_v21 }
  0xee   : > { %1024 = vmatmul.mubr.f32.gmra.mrb[52].mxu0 %v434_v25 }
  0xef   : > { %731 = vmatmul.mubr.f32.gmra.mrb[40].mxu1 %v414_v23  ;;  %1029 = vmatprep.mubr.f32.mxu0 %v1857_v0 }
  0xf0   : > { %736 = vmatprep.mubr.f32.mxu1 %v418_v24 }
  0xf2   : > { %1030 = vmatmul.mubr.f32.gmra.mrb[54].mxu0 %v437_v28 }
  0xf3   : > { %737 = vmatmul.mubr.f32.gmra.mrb[42].mxu1 %v417_v26  ;;  %1035 = vmatprep.mubr.f32.mxu0 %v1857_v0 }
  0xf4   : > { %742 = vmatprep.mubr.f32.mxu1 %v421_v27 }
  0xf6   : > { %1036 = vmatmul.mubr.f32.gmra.mrb[56].mxu0 %v440_v31 }
  0xf7   : > { %743 = vmatmul.mubr.f32.gmra.mrb[44].mxu1 %v420_v29  ;;  %1041 = vmatprep.mubr.f32.mxu0 %v1857_v0 }
  0xf8   : > { %748 = vmatprep.mubr.f32.mxu1 %v424_v30 }
  0xfa   : > { %1042 = vmatmul.mubr.f32.gmra.mrb[58].mxu0 %v443_v34 }
  0xfb   : > { %749 = vmatmul.mubr.f32.gmra.mrb[46].mxu1 %v423_v32  ;;  %1047 = vmatprep.mubr.f32.mxu0 %v1857_v0 }
  0xfc   : > { %754 = vmatprep.mubr.f32.mxu1 %v427_v33 }
  0xfe   : > { %1048 = vmatmul.mubr.f32.gmra.mrb[60].mxu0 %v446_v37 }
  0xff   : > { %755 = vmatmul.mubr.f32.gmra.mrb[48].mxu1 %v426_v35  ;;  %1053 = vmatprep.mubr.f32.mxu0 %v1857_v0  ;;  %v444_v0 = vld [vmem:[#allocation3 + $0x2d0] sm:$0xff] }
 0x100   : > { %760 = vmatprep.mubr.f32.mxu1 %v430_v36 }
 0x102   : > { %1054 = vmatmul.mubr.f32.gmra.mrb[62].mxu0 %v449_v40 }
 0x103   : > { %761 = vmatmul.mubr.f32.gmra.mrb[50].mxu1 %v429_v38 }
 0x104   : > { %766 = vmatprep.mubr.f32.mxu1 %v433_v39 }
 0x107   : > { %767 = vmatmul.mubr.f32.gmra.mrb[52].mxu1 %v432_v41 }
 0x108   : > { %772 = vmatprep.mubr.f32.mxu1 %v436_v42 }
 0x10b   : > { %773 = vmatmul.mubr.f32.gmra.mrb[54].mxu1 %v435_v43 }
 0x10c   : > { %778 = vmatprep.mubr.f32.mxu1 %v439_v44 }
 0x10f   : > { %779 = vmatmul.mubr.f32.gmra.mrb[56].mxu1 %v438_v45 }
 0x110   : > { %784 = vmatprep.mubr.f32.mxu1 %v442_v46 }
 0x113   : > { %785 = vmatmul.mubr.f32.gmra.mrb[58].mxu1 %v441_v47 }
 0x114   : > { %790 = vmatprep.mubr.f32.mxu1 %v445_v48 }
 0x117   : > { %791 = vmatmul.mubr.f32.gmra.mrb[60].mxu1 %v444_v0 }
 0x118   : > { %796 = vmatprep.mubr.f32.mxu1 %v448_v49 }
 0x11b   : > { %797 = vmatmul.mubr.f32.gmra.mrb[62].mxu1 %v447_v50 }
 0x159   : > { %v869_v51 = vpop.f32.mrb[0].mxu0 }
 0x15a   : > { %v871_v52 = vpop.f32.mrb[1].mxu0 }
 0x15d   : > { %v875_v53 = vpop.f32.mrb[2].mxu0 }
 0x15e   : > { %v877_v54 = vpop.f32.mrb[3].mxu0 }
 0x161   : > { %v881_v55 = vpop.f32.mrb[4].mxu0 }
 0x162   : > { %v883_v56 = vpop.f32.mrb[5].mxu0 }
 0x165   : > { %v887_v57 = vpop.f32.mrb[6].mxu0 }
 0x166   : > { %v889_v58 = vpop.f32.mrb[7].mxu0 }
 0x169   : > { %v893_v59 = vpop.f32.mrb[8].mxu0 }
 0x16a   : > { %v895_v60 = vpop.f32.mrb[9].mxu0 }
 0x16d   : > { %v899_v61 = vpop.f32.mrb[10].mxu0 }
 0x16e   : > { %v901_v63 = vpop.f32.mrb[11].mxu0 }
 0x171   : > { %v905_v4 = vpop.f32.mrb[12].mxu0 }
 0x172   : > { %v612_v62 = vpop.f32.mrb[0].mxu1  ;;  %v907_v6 = vpop.f32.mrb[13].mxu0 }
 0x173   : > { %v870_v1 = vadd.f32 %v869_v51, %v612_v62  ;;  %v614_v2 = vpop.f32.mrb[1].mxu1 }
 0x174   : > { %v872_v3 = vadd.f32 %v871_v52, %v614_v2 }
 0x175   : > { %1255 = vst [vmem:[%s2173_s19] sm:$0xff] %v870_v1  ;;  %v911_v10 = vpop.f32.mrb[14].mxu0 }
 0x176   : > { %1256 = vst [vmem:[%s2173_s19 + $0x8] sm:$0xff] %v872_v3  ;;  %v618_v5 = vpop.f32.mrb[2].mxu1  ;;  %v913_v12 = vpop.f32.mrb[15].mxu0 }
 0x177   : > { %v876_v7 = vadd.f32 %v875_v53, %v618_v5  ;;  %v620_v8 = vpop.f32.mrb[3].mxu1 }
 0x178   : > { %v878_v9 = vadd.f32 %v877_v54, %v620_v8 }
 0x179   : > { %1257 = vst [vmem:[%s2173_s19 + $0x10] sm:$0xff] %v876_v7  ;;  %v917_v16 = vpop.f32.mrb[16].mxu0 }
 0x17a   : > { %1258 = vst [vmem:[%s2173_s19 + $0x18] sm:$0xff] %v878_v9  ;;  %v624_v11 = vpop.f32.mrb[4].mxu1  ;;  %v919_v18 = vpop.f32.mrb[17].mxu0 }
 0x17b   : > { %v882_v13 = vadd.f32 %v881_v55, %v624_v11  ;;  %v626_v14 = vpop.f32.mrb[5].mxu1 }
 0x17c   : > { %v884_v15 = vadd.f32 %v883_v56, %v626_v14 }
 0x17d   : > { %1259 = vst [vmem:[%s2173_s19 + $0x20] sm:$0xff] %v882_v13  ;;  %v923_v22 = vpop.f32.mrb[18].mxu0 }
 0x17e   : > { %1260 = vst [vmem:[%s2173_s19 + $0x28] sm:$0xff] %v884_v15  ;;  %v630_v17 = vpop.f32.mrb[6].mxu1  ;;  %v925_v24 = vpop.f32.mrb[19].mxu0 }
 0x17f   : > { %v888_v19 = vadd.f32 %v887_v57, %v630_v17  ;;  %v632_v20 = vpop.f32.mrb[7].mxu1 }
 0x180   : > { %v890_v21 = vadd.f32 %v889_v58, %v632_v20 }
 0x181   : > { %1261 = vst [vmem:[%s2173_s19 + $0x30] sm:$0xff] %v888_v19  ;;  %v929_v28 = vpop.f32.mrb[20].mxu0 }
 0x182   : > { %1262 = vst [vmem:[%s2173_s19 + $0x38] sm:$0xff] %v890_v21  ;;  %v636_v23 = vpop.f32.mrb[8].mxu1  ;;  %v931_v30 = vpop.f32.mrb[21].mxu0 }
 0x183   : > { %v894_v25 = vadd.f32 %v893_v59, %v636_v23  ;;  %v638_v26 = vpop.f32.mrb[9].mxu1 }
 0x184   : > { %v896_v27 = vadd.f32 %v895_v60, %v638_v26 }
 0x185   : > { %1263 = vst [vmem:[%s2173_s19 + $0x40] sm:$0xff] %v894_v25  ;;  %v935_v34 = vpop.f32.mrb[22].mxu0 }
 0x186   : > { %1264 = vst [vmem:[%s2173_s19 + $0x48] sm:$0xff] %v896_v27  ;;  %v642_v29 = vpop.f32.mrb[10].mxu1  ;;  %v937_v36 = vpop.f32.mrb[23].mxu0 }
 0x187   : > { %v900_v31 = vadd.f32 %v899_v61, %v642_v29  ;;  %v644_v32 = vpop.f32.mrb[11].mxu1 }
 0x188   : > { %v902_v33 = vadd.f32 %v901_v63, %v644_v32 }
 0x189   : > { %1265 = vst [vmem:[%s2173_s19 + $0x50] sm:$0xff] %v900_v31  ;;  %v941_v40 = vpop.f32.mrb[24].mxu0 }
 0x18a   : > { %1266 = vst [vmem:[%s2173_s19 + $0x58] sm:$0xff] %v902_v33  ;;  %v648_v35 = vpop.f32.mrb[12].mxu1  ;;  %v943_v42 = vpop.f32.mrb[25].mxu0 }
 0x18b   : > { %v906_v37 = vadd.f32 %v905_v4, %v648_v35  ;;  %v650_v38 = vpop.f32.mrb[13].mxu1 }
 0x18c   : > { %v908_v39 = vadd.f32 %v907_v6, %v650_v38 }
 0x18d   : > { %1267 = vst [vmem:[%s2173_s19 + $0x60] sm:$0xff] %v906_v37  ;;  %v947_v46 = vpop.f32.mrb[26].mxu0 }
 0x18e   : > { %1268 = vst [vmem:[%s2173_s19 + $0x68] sm:$0xff] %v908_v39  ;;  %v654_v41 = vpop.f32.mrb[14].mxu1  ;;  %v949_v48 = vpop.f32.mrb[27].mxu0 }
 0x18f   : > { %v912_v43 = vadd.f32 %v911_v10, %v654_v41  ;;  %v656_v44 = vpop.f32.mrb[15].mxu1 }
 0x190   : > { %v914_v45 = vadd.f32 %v913_v12, %v656_v44 }
 0x191   : > { %1269 = vst [vmem:[%s2173_s19 + $0x70] sm:$0xff] %v912_v43  ;;  %v953_v51 = vpop.f32.mrb[28].mxu0 }
 0x192   : > { %1270 = vst [vmem:[%s2173_s19 + $0x78] sm:$0xff] %v914_v45  ;;  %v660_v47 = vpop.f32.mrb[16].mxu1  ;;  %v955_v53 = vpop.f32.mrb[29].mxu0 }
 0x193   : > { %v918_v0 = vadd.f32 %v917_v16, %v660_v47  ;;  %v662_v49 = vpop.f32.mrb[17].mxu1 }
 0x194   : > { %v920_v50 = vadd.f32 %v919_v18, %v662_v49 }
 0x195   : > { %1271 = vst [vmem:[%s2173_s19 + $0x80] sm:$0xff] %v918_v0  ;;  %v959_v57 = vpop.f32.mrb[30].mxu0 }
 0x196   : > { %1272 = vst [vmem:[%s2173_s19 + $0x88] sm:$0xff] %v920_v50  ;;  %v666_v52 = vpop.f32.mrb[18].mxu1  ;;  %v961_v59 = vpop.f32.mrb[31].mxu0 }
 0x197   : > { %v924_v54 = vadd.f32 %v923_v22, %v666_v52  ;;  %v668_v55 = vpop.f32.mrb[19].mxu1 }
 0x198   : > { %v926_v56 = vadd.f32 %v925_v24, %v668_v55 }
 0x199   : > { %1273 = vst [vmem:[%s2173_s19 + $0x90] sm:$0xff] %v924_v54  ;;  %v965_v63 = vpop.f32.mrb[32].mxu0 }
 0x19a   : > { %1274 = vst [vmem:[%s2173_s19 + $0x98] sm:$0xff] %v926_v56  ;;  %v672_v58 = vpop.f32.mrb[20].mxu1  ;;  %v967_v2 = vpop.f32.mrb[33].mxu0 }
 0x19b   : > { %v930_v60 = vadd.f32 %v929_v28, %v672_v58  ;;  %v674_v61 = vpop.f32.mrb[21].mxu1 }
 0x19c   : > { %v932_v62 = vadd.f32 %v931_v30, %v674_v61 }
 0x19d   : > { %1275 = vst [vmem:[%s2173_s19 + $0xa0] sm:$0xff] %v930_v60  ;;  %v971_v6 = vpop.f32.mrb[34].mxu0 }
 0x19e   : > { %1276 = vst [vmem:[%s2173_s19 + $0xa8] sm:$0xff] %v932_v62  ;;  %v678_v1 = vpop.f32.mrb[22].mxu1  ;;  %v973_v8 = vpop.f32.mrb[35].mxu0 }
 0x19f   : > { %v936_v3 = vadd.f32 %v935_v34, %v678_v1  ;;  %v680_v4 = vpop.f32.mrb[23].mxu1 }
 0x1a0   : > { %v938_v5 = vadd.f32 %v937_v36, %v680_v4 }
 0x1a1   : > { %1277 = vst [vmem:[%s2173_s19 + $0xb0] sm:$0xff] %v936_v3  ;;  %v977_v12 = vpop.f32.mrb[36].mxu0 }
 0x1a2   : > { %1278 = vst [vmem:[%s2173_s19 + $0xb8] sm:$0xff] %v938_v5  ;;  %v684_v7 = vpop.f32.mrb[24].mxu1  ;;  %v979_v14 = vpop.f32.mrb[37].mxu0 }
 0x1a3   : > { %v942_v9 = vadd.f32 %v941_v40, %v684_v7  ;;  %v686_v10 = vpop.f32.mrb[25].mxu1 }
 0x1a4   : > { %v944_v11 = vadd.f32 %v943_v42, %v686_v10 }
 0x1a5   : > { %1279 = vst [vmem:[%s2173_s19 + $0xc0] sm:$0xff] %v942_v9  ;;  %v983_v18 = vpop.f32.mrb[38].mxu0 }
 0x1a6   : > { %1280 = vst [vmem:[%s2173_s19 + $0xc8] sm:$0xff] %v944_v11  ;;  %v690_v13 = vpop.f32.mrb[26].mxu1  ;;  %v985_v20 = vpop.f32.mrb[39].mxu0 }
 0x1a7   : > { %v948_v15 = vadd.f32 %v947_v46, %v690_v13  ;;  %v692_v16 = vpop.f32.mrb[27].mxu1 }
 0x1a8   : > { %v950_v17 = vadd.f32 %v949_v48, %v692_v16 }
 0x1a9   : > { %1281 = vst [vmem:[%s2173_s19 + $0xd0] sm:$0xff] %v948_v15  ;;  %v989_v24 = vpop.f32.mrb[40].mxu0 }
 0x1aa   : > { %1282 = vst [vmem:[%s2173_s19 + $0xd8] sm:$0xff] %v950_v17  ;;  %v696_v19 = vpop.f32.mrb[28].mxu1  ;;  %v991_v26 = vpop.f32.mrb[41].mxu0 }
 0x1ab   : > { %v954_v21 = vadd.f32 %v953_v51, %v696_v19  ;;  %v698_v22 = vpop.f32.mrb[29].mxu1 }
 0x1ac   : > { %v956_v23 = vadd.f32 %v955_v53, %v698_v22 }
 0x1ad   : > { %1283 = vst [vmem:[%s2173_s19 + $0xe0] sm:$0xff] %v954_v21  ;;  %v995_v30 = vpop.f32.mrb[42].mxu0 }
 0x1ae   : > { %1284 = vst [vmem:[%s2173_s19 + $0xe8] sm:$0xff] %v956_v23  ;;  %v702_v25 = vpop.f32.mrb[30].mxu1  ;;  %v997_v32 = vpop.f32.mrb[43].mxu0 }
 0x1af   : > { %v960_v27 = vadd.f32 %v959_v57, %v702_v25  ;;  %v704_v28 = vpop.f32.mrb[31].mxu1 }
 0x1b0   : > { %v962_v29 = vadd.f32 %v961_v59, %v704_v28 }
 0x1b1   : > { %1285 = vst [vmem:[%s2173_s19 + $0xf0] sm:$0xff] %v960_v27  ;;  %v1001_v36 = vpop.f32.mrb[44].mxu0 }
 0x1b2   : > { %1286 = vst [vmem:[%s2173_s19 + $0xf8] sm:$0xff] %v962_v29  ;;  %v708_v31 = vpop.f32.mrb[32].mxu1  ;;  %v1003_v38 = vpop.f32.mrb[45].mxu0 }
 0x1b3   : > { %v966_v33 = vadd.f32 %v965_v63, %v708_v31  ;;  %v710_v34 = vpop.f32.mrb[33].mxu1 }
 0x1b4   : > { %v968_v35 = vadd.f32 %v967_v2, %v710_v34 }
 0x1b5   : > { %1287 = vst [vmem:[%s2173_s19 + $0x100] sm:$0xff] %v966_v33  ;;  %v1007_v42 = vpop.f32.mrb[46].mxu0 }
 0x1b6   : > { %1288 = vst [vmem:[%s2173_s19 + $0x108] sm:$0xff] %v968_v35  ;;  %v714_v37 = vpop.f32.mrb[34].mxu1  ;;  %v1009_v44 = vpop.f32.mrb[47].mxu0 }
 0x1b7   : > { %v972_v39 = vadd.f32 %v971_v6, %v714_v37  ;;  %v716_v40 = vpop.f32.mrb[35].mxu1 }
 0x1b8   : > { %v974_v41 = vadd.f32 %v973_v8, %v716_v40 }
 0x1b9   : > { %1289 = vst [vmem:[%s2173_s19 + $0x110] sm:$0xff] %v972_v39  ;;  %v1013_v48 = vpop.f32.mrb[48].mxu0 }
 0x1ba   : > { %1290 = vst [vmem:[%s2173_s19 + $0x118] sm:$0xff] %v974_v41  ;;  %v720_v43 = vpop.f32.mrb[36].mxu1  ;;  %v1015_v49 = vpop.f32.mrb[49].mxu0 }
 0x1bb   : > { %v978_v45 = vadd.f32 %v977_v12, %v720_v43  ;;  %v722_v46 = vpop.f32.mrb[37].mxu1 }
 0x1bc   : > { %v980_v47 = vadd.f32 %v979_v14, %v722_v46 }
 0x1bd   : > { %1291 = vst [vmem:[%s2173_s19 + $0x120] sm:$0xff] %v978_v45  ;;  %v1019_v53 = vpop.f32.mrb[50].mxu0 }
 0x1be   : > { %1292 = vst [vmem:[%s2173_s19 + $0x128] sm:$0xff] %v980_v47  ;;  %v726_v0 = vpop.f32.mrb[38].mxu1  ;;  %v1021_v55 = vpop.f32.mrb[51].mxu0 }
 0x1bf   : > { %v984_v50 = vadd.f32 %v983_v18, %v726_v0  ;;  %v728_v51 = vpop.f32.mrb[39].mxu1 }
 0x1c0   : > { %v986_v52 = vadd.f32 %v985_v20, %v728_v51 }
 0x1c1   : > { %1293 = vst [vmem:[%s2173_s19 + $0x130] sm:$0xff] %v984_v50  ;;  %v1025_v59 = vpop.f32.mrb[52].mxu0 }
 0x1c2   : > { %1294 = vst [vmem:[%s2173_s19 + $0x138] sm:$0xff] %v986_v52  ;;  %v732_v54 = vpop.f32.mrb[40].mxu1  ;;  %v1027_v61 = vpop.f32.mrb[53].mxu0 }
 0x1c3   : > { %v990_v56 = vadd.f32 %v989_v24, %v732_v54  ;;  %v734_v57 = vpop.f32.mrb[41].mxu1 }
 0x1c4   : > { %v992_v58 = vadd.f32 %v991_v26, %v734_v57 }
 0x1c5   : > { %1295 = vst [vmem:[%s2173_s19 + $0x140] sm:$0xff] %v990_v56  ;;  %v1031_v2 = vpop.f32.mrb[54].mxu0 }
 0x1c6   : > { %1296 = vst [vmem:[%s2173_s19 + $0x148] sm:$0xff] %v992_v58  ;;  %v738_v60 = vpop.f32.mrb[42].mxu1  ;;  %v1033_v4 = vpop.f32.mrb[55].mxu0 }
 0x1c7   : > { %v996_v62 = vadd.f32 %v995_v30, %v738_v60  ;;  %v740_v63 = vpop.f32.mrb[43].mxu1 }
 0x1c8   : > { %v998_v1 = vadd.f32 %v997_v32, %v740_v63 }
 0x1c9   : > { %1297 = vst [vmem:[%s2173_s19 + $0x150] sm:$0xff] %v996_v62  ;;  %v1037_v8 = vpop.f32.mrb[56].mxu0 }
 0x1ca   : > { %1298 = vst [vmem:[%s2173_s19 + $0x158] sm:$0xff] %v998_v1  ;;  %v744_v3 = vpop.f32.mrb[44].mxu1  ;;  %v1039_v10 = vpop.f32.mrb[57].mxu0 }
 0x1cb   : > { %v1002_v5 = vadd.f32 %v1001_v36, %v744_v3  ;;  %v746_v6 = vpop.f32.mrb[45].mxu1 }
 0x1cc   : > { %v1004_v7 = vadd.f32 %v1003_v38, %v746_v6 }
 0x1cd   : > { %1299 = vst [vmem:[%s2173_s19 + $0x160] sm:$0xff] %v1002_v5  ;;  %v1043_v14 = vpop.f32.mrb[58].mxu0 }
 0x1ce   : > { %1300 = vst [vmem:[%s2173_s19 + $0x168] sm:$0xff] %v1004_v7  ;;  %v750_v9 = vpop.f32.mrb[46].mxu1  ;;  %v1045_v16 = vpop.f32.mrb[59].mxu0 }
 0x1cf   : > { %v1008_v11 = vadd.f32 %v1007_v42, %v750_v9  ;;  %v752_v12 = vpop.f32.mrb[47].mxu1 }
 0x1d0   : > { %v1010_v13 = vadd.f32 %v1009_v44, %v752_v12 }
 0x1d1   : > { %1301 = vst [vmem:[%s2173_s19 + $0x170] sm:$0xff] %v1008_v11  ;;  %v1049_v20 = vpop.f32.mrb[60].mxu0 }
 0x1d2   : > { %1302 = vst [vmem:[%s2173_s19 + $0x178] sm:$0xff] %v1010_v13  ;;  %v756_v15 = vpop.f32.mrb[48].mxu1  ;;  %v1051_v22 = vpop.f32.mrb[61].mxu0 }
 0x1d3   : > { %v1014_v17 = vadd.f32 %v1013_v48, %v756_v15  ;;  %v758_v18 = vpop.f32.mrb[49].mxu1 }
 0x1d4   : > { %v1016_v19 = vadd.f32 %v1015_v49, %v758_v18 }
 0x1d5   : > { %1303 = vst [vmem:[%s2173_s19 + $0x180] sm:$0xff] %v1014_v17  ;;  %v1055_v26 = vpop.f32.mrb[62].mxu0 }
 0x1d6   : > { %1304 = vst [vmem:[%s2173_s19 + $0x188] sm:$0xff] %v1016_v19  ;;  %v762_v21 = vpop.f32.mrb[50].mxu1  ;;  %v1057_v28 = vpop.f32.mrb[63].mxu0 }
 0x1d7   : > { %v1020_v23 = vadd.f32 %v1019_v53, %v762_v21  ;;  %v764_v24 = vpop.f32.mrb[51].mxu1 }
 0x1d8   : > { %v1022_v25 = vadd.f32 %v1021_v55, %v764_v24 }
 0x1d9   : > { %1305 = vst [vmem:[%s2173_s19 + $0x190] sm:$0xff] %v1020_v23 }
 0x1da   : > { %1306 = vst [vmem:[%s2173_s19 + $0x198] sm:$0xff] %v1022_v25  ;;  %v768_v27 = vpop.f32.mrb[52].mxu1 }
 0x1db   : > { %v1026_v29 = vadd.f32 %v1025_v59, %v768_v27  ;;  %v770_v30 = vpop.f32.mrb[53].mxu1 }
 0x1dc   : > { %v1028_v31 = vadd.f32 %v1027_v61, %v770_v30 }
 0x1dd   : > { %1307 = vst [vmem:[%s2173_s19 + $0x1a0] sm:$0xff] %v1026_v29 }
 0x1de   : > { %1308 = vst [vmem:[%s2173_s19 + $0x1a8] sm:$0xff] %v1028_v31  ;;  %v774_v32 = vpop.f32.mrb[54].mxu1 }
 0x1df   : > { %v1032_v33 = vadd.f32 %v1031_v2, %v774_v32  ;;  %v776_v34 = vpop.f32.mrb[55].mxu1 }
 0x1e0   : > { %v1034_v35 = vadd.f32 %v1033_v4, %v776_v34 }
 0x1e1   : > { %1309 = vst [vmem:[%s2173_s19 + $0x1b0] sm:$0xff] %v1032_v33 }
 0x1e2   : > { %1310 = vst [vmem:[%s2173_s19 + $0x1b8] sm:$0xff] %v1034_v35  ;;  %v780_v36 = vpop.f32.mrb[56].mxu1 }
 0x1e3   : > { %v1038_v37 = vadd.f32 %v1037_v8, %v780_v36  ;;  %v782_v38 = vpop.f32.mrb[57].mxu1 }
 0x1e4   : > { %v1040_v39 = vadd.f32 %v1039_v10, %v782_v38 }
 0x1e5   : > { %1311 = vst [vmem:[%s2173_s19 + $0x1c0] sm:$0xff] %v1038_v37 }
 0x1e6   : > { %1312 = vst [vmem:[%s2173_s19 + $0x1c8] sm:$0xff] %v1040_v39  ;;  %v786_v40 = vpop.f32.mrb[58].mxu1 }
 0x1e7   : > { %v1044_v41 = vadd.f32 %v1043_v14, %v786_v40  ;;  %v788_v42 = vpop.f32.mrb[59].mxu1 }
 0x1e8   : > { %v1046_v43 = vadd.f32 %v1045_v16, %v788_v42 }
 0x1e9   : > { %1313 = vst [vmem:[%s2173_s19 + $0x1d0] sm:$0xff] %v1044_v41 }
 0x1ea   : > { %1314 = vst [vmem:[%s2173_s19 + $0x1d8] sm:$0xff] %v1046_v43  ;;  %v792_v44 = vpop.f32.mrb[60].mxu1 }
 0x1eb   : > { %v1050_v45 = vadd.f32 %v1049_v20, %v792_v44  ;;  %v794_v46 = vpop.f32.mrb[61].mxu1 }
 0x1ec   : > { %v1052_v47 = vadd.f32 %v1051_v22, %v794_v46 }
 0x1ed   : > { %1315 = vst [vmem:[%s2173_s19 + $0x1e0] sm:$0xff] %v1050_v45 }
 0x1ee   : > { %1316 = vst [vmem:[%s2173_s19 + $0x1e8] sm:$0xff] %v1052_v47  ;;  %v798_v48 = vpop.f32.mrb[62].mxu1 }
 0x1ef   : > { %v1056_v0 = vadd.f32 %v1055_v26, %v798_v48  ;;  %v800_v49 = vpop.f32.mrb[63].mxu1 }
 0x1f0   : > { %v1058_v50 = vadd.f32 %v1057_v28, %v800_v49 }
 0x1f1   : > { %1317 = vst [vmem:[%s2173_s19 + $0x1f0] sm:$0xff] %v1056_v0 }
 0x1f2   : > { %1318 = vst [vmem:[%s2173_s19 + $0x1f8] sm:$0xff] %v1058_v50 }
 0x1f3   : > { %1775 = shalt.err (!%p1772_p6)
}
 0x1f4   : > { %s1776_s24 = scalar_lea.hbm %s2242_s8, 8192  ;;  %s1780_s30 = scalar_lea.hbm %s2297_s2, 16384 }
 0x1f5   : > { %p1777_p0 = scmp.ne.s32.totalorder %s2242_s8, %s1776_s24  ;;  %p1781_p12 = scmp.lt.u32.totalorder %s2242_s8, %s2297_s2 }
 0x1f6   : > { %p1782_p5 = scmp.lt.u32.totalorder %s1780_s30, %s1776_s24  ;;  %p1784_p9 = scmp.lt.u32.totalorder %s1776_s24, %s2242_s8 }
 0x1f7   : > { %p1778_p2 = pnand %p1777_p0, %p2316_p11 }
 0x1f8   : > { %p1783_p8 = por %p1782_p5, %p1781_p12 }
 0x1f9   : > { %p1779_p7 = pneg %p1778_p2 }
 0x1fa   : > { %p1785_p13 = por %p1784_p9, %p1783_p8 }
 0x1fc   : > { %p1786_p4 = pnand %p1785_p13, %p1779_p7 }
 0x1fe   : > { %1789 = shalt.err (!%p1786_p4)
}
 0x1ff   : > { %s1859_s17 = smov 256   ;;  %s1860_s19 = smov 512  }
 0x200   : > { %s1861_s22 = smov 16  }
 0x201   : > { %1628 = dma.vmem_to_hbm [thread:$0]  (%p2316_p11), %s2244_s26, 8192, %s2242_s8, %s1320_s12, %s1859_s17, %s1860_s19, %s1861_s22  }
 0x202 PF: > { %s1351_s25 = sand.u32 1, %s1828_s9   ;;  %p2317_p1 = scmp.ne.s32.totalorder %s2308_s21, 0 }
 0x203   : > { %p2318_p10 = scmp.ge.s32.totalorder %s1848_s14, 2  ;;  %s1352_s6 = scalar_lea.sflag [#allocation5], %s1351_s25 }
 0x205   : > { %p1639_p3 = pnand %p2318_p10, %p2317_p1 }
 0x207   : > { %1823 = dma.done.wait (!%p1639_p3), %s1352_s6, 8192  }
 0x208   : > { %1825 = vsyncadd (!%p1639_p3), %s1352_s6, 4294959104  ;;  %s19_s14 = sadd.s32 1, %s1848_s14   ;;  %s2319_s9 = smov %s1832_s10 }
 0x209   : > { %p16_p6 = scmp.ge.s32.totalorder %s19_s14, 4   ;;  %s2320_s10 = smov %s1836_s11 }
 0x20a   : > { %s2321_s11 = smov %s1995_s7  ;;  %s2322_s12 = smov %s1844_s13 }
 0x20b   : > { %s2323_s13 = smov %s2325_s27  ;;  %18 = sbr.rel (!%p16_p6) target bundleno = 7 (0x7), region = 87 }
 0x212   :  { %1357 = vsyncpa [#allocation4], 1 }
 0x213   :  { %1359 = vsyncpa [#allocation4 + $0x1], 1 }
 0x214   :  { %1360 = vsyncpa [#allocation7], 1 }
 0x215   :  { %1362 = vsyncpa [#allocation7 + $0x1], 1 }
 0x216   :  { %1363 = vsyncpa [#allocation5], 1 }
 0x217   :  { %1365 = vsyncpa [#allocation5 + $0x1], 1 }

</bundles_post_ra>
